<compile_context>
chip_gen: v7x
topology: tpu7x:2x2x1
jax: 0.10.0
libtpu: 0.0.40
codegen_flags: <defaults>
</compile_context>

<pallas_src>
import jax
import jax.numpy as jnp
from jax.experimental import pallas as pl
from jax.experimental.pallas import tpu as pltpu

Z_DIM = 100
HIDDEN = 128
OUT = 784            # 28 * 28
K_PAD = 128          # Z_DIM padded to a full lane tile (zero pad -> exact math)
_SUBLANE = 16        # row-tile granularity, safe for both f32 and bf16 blocks


def _round_up(x, m):
    return ((x + m - 1) // m) * m


def _generator_kernel(x_ref, w1_ref, b1_ref, w2_ref, b2_ref, o_ref):
    # fc1 on the MXU with f32 accumulation, bias + LeakyReLU(0.2) in f32.
    h = jnp.dot(x_ref[...], w1_ref[...], preferred_element_type=jnp.float32)
    h = h + b1_ref[...]                      # (tm, 128) + (1, 128) broadcast
    h = jnp.where(h > 0, h, 0.2 * h)         # LeakyReLU; matches torch at h==0
    # fc2 on the MXU with f32 accumulation, bias + tanh; store 784 lanes directly.
    y = jnp.dot(h.astype(w2_ref.dtype), w2_ref[...],
                preferred_element_type=jnp.float32)
    y = y + b2_ref[...]                      # (tm, 784) + (1, 784) broadcast
    o_ref[...] = jnp.tanh(y)


def prepare_params(w1, b1, w2, b2, *, weights_dtype=jnp.bfloat16):
    """One-time pad / cast of the generator parameters for the Pallas kernel.

    Expects weights in (in, out) layout: w1 (100, 128), w2 (128, 784) and
    biases of shape (128,) / (784,) (or already (1, n)).  A PyTorch state
    dict would pass fc1.weight.T / fc2.weight.T here.
    """
    w1_p = jnp.pad(jnp.asarray(w1, jnp.float32),
                   ((0, K_PAD - Z_DIM), (0, 0))).astype(weights_dtype)
    w2_p = jnp.asarray(w2, weights_dtype)
    b1_p = jnp.asarray(b1, jnp.float32).reshape(1, HIDDEN)
    b2_p = jnp.asarray(b2, jnp.float32).reshape(1, OUT)
    return w1_p, b1_p, w2_p, b2_p


def generator_forward(x, params, *, block_b=512):
    """x: (B, Z_DIM) f32, params from prepare_params -> (B, 1, 28, 28) f32."""
    w1_p, b1_p, w2_p, b2_p = params
    B = x.shape[0]
    in_dtype = w1_p.dtype
    block_b = max(_SUBLANE, _round_up(block_b, _SUBLANE))

    # >= 2 grid steps so both v7x TensorCores get work, and a tile sized to the
    # batch so awkward B doesn't pad up to a full block.
    steps = max(2, pl.cdiv(B, block_b))
    tm = _round_up(pl.cdiv(B, steps), _SUBLANE)
    tm = min(tm, block_b, _round_up(B, _SUBLANE))
    grid_n = pl.cdiv(B, tm)
    B_pad = grid_n * tm

    # Per-call: pad batch rows to B_pad, pad K 100->128 with zeros (exact math),
    # cast to the matmul dtype.  Weights are already padded/cast (one-time).
    x_p = jnp.pad(x, ((0, B_pad - B), (0, K_PAD - Z_DIM))).astype(in_dtype)

    itemsize = jnp.dtype(in_dtype).itemsize
    flops = 2 * B_pad * (K_PAD * HIDDEN + HIDDEN * OUT)
    bytes_accessed = (x_p.size * itemsize
                      + (K_PAD * HIDDEN + HIDDEN * OUT) * itemsize
                      + (HIDDEN + OUT) * 4
                      + B_pad * OUT * 4)
    cost = pl.CostEstimate(flops=flops,
                           transcendentals=B_pad * OUT,
                           bytes_accessed=bytes_accessed)

    out = pl.pallas_call(
        _generator_kernel,
        out_shape=jax.ShapeDtypeStruct((B_pad, OUT), jnp.float32),
        grid=(grid_n,),
        in_specs=[
            pl.BlockSpec((tm, K_PAD), lambda i: (i, 0)),       # x tile
            pl.BlockSpec((K_PAD, HIDDEN), lambda i: (0, 0)),   # w1 resident
            pl.BlockSpec((1, HIDDEN), lambda i: (0, 0)),       # b1 resident
            pl.BlockSpec((HIDDEN, OUT), lambda i: (0, 0)),     # w2 resident
            pl.BlockSpec((1, OUT), lambda i: (0, 0)),          # b2 resident
        ],
        out_specs=pl.BlockSpec((tm, OUT), lambda i: (i, 0)),
        compiler_params=pltpu.CompilerParams(
            dimension_semantics=("parallel",),                 # 2 TCs on v7x
        ),
        cost_estimate=cost,
    )(x_p, w1_p, b1_p, w2_p, b2_p)

    if B_pad != B:
        out = out[:B]
    return out.reshape(B, 1, 28, 28)


def init_params(key):
    """PyTorch nn.Linear default init U(-1/sqrt(fan_in), +), stored as (in, out)."""
    k1, k2, k3, k4 = jax.random.split(key, 4)
    bound1 = 1.0 / (Z_DIM ** 0.5)
    bound2 = 1.0 / (HIDDEN ** 0.5)
    w1 = jax.random.uniform(k1, (Z_DIM, HIDDEN), jnp.float32, -bound1, bound1)
    b1 = jax.random.uniform(k2, (HIDDEN,), jnp.float32, -bound1, bound1)
    w2 = jax.random.uniform(k3, (HIDDEN, OUT), jnp.float32, -bound2, bound2)
    b2 = jax.random.uniform(k4, (OUT,), jnp.float32, -bound2, bound2)
    return w1, b1, w2, b2


def _reference(x, w1, b1, w2, b2):
    h = x @ w1 + b1
    h = jnp.where(h > 0, h, 0.2 * h)
    return jnp.tanh(h @ w2 + b2).reshape(x.shape[0], 1, 28, 28)


if __name__ == "__main__":
    key = jax.random.PRNGKey(0)
    k_params, k_x1, k_x2 = jax.random.split(key, 3)
    w1, b1, w2, b2 = init_params(k_params)

    params_f32 = prepare_params(w1, b1, w2, b2, weights_dtype=jnp.float32)
    params_bf16 = prepare_params(w1, b1, w2, b2, weights_dtype=jnp.bfloat16)

    # Small batch: single grid step; f32 path must match the reference tightly.
    B_small = 8
    x_small = jax.random.normal(k_x1, (B_small, Z_DIM), jnp.float32)
    out_f32 = generator_forward(x_small, params_f32)
    jax.block_until_ready(out_f32)
    ref_small = _reference(x_small, w1, b1, w2, b2)
    assert out_f32.shape == (B_small, 1, 28, 28)
    assert jnp.allclose(out_f32, ref_small, atol=2e-5, rtol=1e-5)

    # Default bf16 fast path on the same input (loose tolerance for bf16 matmuls).
    out_bf16 = generator_forward(x_small, params_bf16)
    jax.block_until_ready(out_bf16)
    assert out_bf16.shape == (B_small, 1, 28, 28)
    assert jnp.allclose(out_bf16, ref_small, atol=3e-2, rtol=3e-2)

    # Awkward batch size: 2 balanced grid steps (tm=112, B_pad=224), exercising
    # batch padding, the parallel grid axis, and VMEM-resident weights.
    B_odd = 200
    x_odd = jax.random.normal(k_x2, (B_odd, Z_DIM), jnp.float32)
    out_odd = generator_forward(x_odd, params_bf16)
    jax.block_until_ready(out_odd)
    ref_odd = _reference(x_odd, w1, b1, w2, b2)
    assert out_odd.shape == (B_odd, 1, 28, 28)
    assert jnp.allclose(out_odd, ref_odd, atol=3e-2, rtol=3e-2)

    print("KERNEL_OK")
</pallas_src>

<mosaic_0001>
module attributes {stable_mosaic.version = 11 : i64} {
  func.func @_generator_kernel(%arg0: i32, %arg1: memref<16x128xf32, #tpu.memory_space<vmem>>, %arg2: memref<128x128xf32, #tpu.memory_space<vmem>>, %arg3: memref<1x128xf32, #tpu.memory_space<vmem>>, %arg4: memref<128x784xf32, #tpu.memory_space<vmem>>, %arg5: memref<1x784xf32, #tpu.memory_space<vmem>>, %arg6: memref<16x784xf32, #tpu.memory_space<vmem>>) attributes {dimension_semantics = [#tpu.dimension_semantics<parallel>], iteration_bounds = array<i64: 1>, scalar_prefetch = 0 : i64, scratch_operands = 0 : i64, tpu.core_type = #tpu.core_type<tc>, window_params = [{transform_indices = @transform_0, window_bounds = array<i64: 16, 128>}, {pipeline_mode = #tpu.pipeline_mode<synchronous>, transform_indices = @transform_1, window_bounds = array<i64: 128, 128>}, {pipeline_mode = #tpu.pipeline_mode<synchronous>, transform_indices = @transform_2, window_bounds = array<i64: 1, 128>}, {pipeline_mode = #tpu.pipeline_mode<synchronous>, transform_indices = @transform_3, window_bounds = array<i64: 128, 784>}, {pipeline_mode = #tpu.pipeline_mode<synchronous>, transform_indices = @transform_4, window_bounds = array<i64: 1, 784>}, {transform_indices = @transform_5, window_bounds = array<i64: 16, 784>}]} {
    %c0 = arith.constant 0 : index
    %c0_0 = arith.constant 0 : index
    %0 = vector.load %arg1[%c0, %c0_0] : memref<16x128xf32, #tpu.memory_space<vmem>>, vector<16x128xf32>
    %c0_1 = arith.constant 0 : index
    %c0_2 = arith.constant 0 : index
    %1 = vector.load %arg2[%c0_1, %c0_2] : memref<128x128xf32, #tpu.memory_space<vmem>>, vector<128x128xf32>
    %cst = arith.constant dense<0.000000e+00> : vector<16x128xf32>
    %2 = tpu.matmul %0, %1, %cst {dimension_numbers = #tpu.dot_dimension_numbers<[1], [0], [0], [1], [0, 0, 1, 1], [], []>} : vector<16x128xf32>, vector<128x128xf32>, vector<16x128xf32> -> vector<16x128xf32>
    %c0_3 = arith.constant 0 : index
    %c0_4 = arith.constant 0 : index
    %3 = vector.load %arg3[%c0_3, %c0_4] : memref<1x128xf32, #tpu.memory_space<vmem>>, vector<1x128xf32>
    %4 = vector.broadcast %3 : vector<1x128xf32> to vector<16x128xf32>
    %5 = arith.addf %2, %4 : vector<16x128xf32>
    %cst_5 = arith.constant 0.000000e+00 : f32
    %6 = vector.broadcast %cst_5 : f32 to vector<16x128xf32>
    %7 = arith.cmpf ogt, %5, %6 : vector<16x128xf32>
    %cst_6 = arith.constant 2.000000e-01 : f32
    %8 = vector.broadcast %cst_6 : f32 to vector<16x128xf32>
    %9 = arith.mulf %8, %5 : vector<16x128xf32>
    %10 = arith.select %7, %5, %9 : vector<16x128xi1>, vector<16x128xf32>
    %c0_7 = arith.constant 0 : index
    %c0_8 = arith.constant 0 : index
    %11 = vector.load %arg4[%c0_7, %c0_8] : memref<128x784xf32, #tpu.memory_space<vmem>>, vector<128x784xf32>
    %cst_9 = arith.constant dense<0.000000e+00> : vector<16x784xf32>
    %12 = tpu.matmul %10, %11, %cst_9 {dimension_numbers = #tpu.dot_dimension_numbers<[1], [0], [0], [1], [0, 0, 1, 1], [], []>} : vector<16x128xf32>, vector<128x784xf32>, vector<16x784xf32> -> vector<16x784xf32>
    %c0_10 = arith.constant 0 : index
    %c0_11 = arith.constant 0 : index
    %13 = vector.load %arg5[%c0_10, %c0_11] : memref<1x784xf32, #tpu.memory_space<vmem>>, vector<1x784xf32>
    %14 = vector.broadcast %13 : vector<1x784xf32> to vector<16x784xf32>
    %15 = arith.addf %12, %14 : vector<16x784xf32>
    %16 = math.tanh %15 : vector<16x784xf32>
    %c0_12 = arith.constant 0 : index
    %c0_13 = arith.constant 0 : index
    %17 = vector.load %arg6[%c0_12, %c0_13] : memref<16x784xf32, #tpu.memory_space<vmem>>, vector<16x784xf32>
    tpu.vector_store %arg6[%c0_12, %c0_13], %16 {strides = array<i32>} : memref<16x784xf32, #tpu.memory_space<vmem>>, vector<16x784xf32>,
    return
  }
  func.func @transform_0(%arg0: i32) -> (i32, i32) {
    %c0_i32 = arith.constant 0 : i32
    %c0_i32_0 = arith.constant 0 : i32
    return %arg0, %c0_i32 : i32, i32
  }
  func.func @transform_1(%arg0: i32) -> (i32, i32) {
    %c0_i32 = arith.constant 0 : i32
    %c0_i32_0 = arith.constant 0 : i32
    %c0_i32_1 = arith.constant 0 : i32
    return %c0_i32, %c0_i32_0 : i32, i32
  }
  func.func @transform_2(%arg0: i32) -> (i32, i32) {
    %c0_i32 = arith.constant 0 : i32
    %c0_i32_0 = arith.constant 0 : i32
    %c0_i32_1 = arith.constant 0 : i32
    return %c0_i32, %c0_i32_0 : i32, i32
  }
  func.func @transform_3(%arg0: i32) -> (i32, i32) {
    %c0_i32 = arith.constant 0 : i32
    %c0_i32_0 = arith.constant 0 : i32
    %c0_i32_1 = arith.constant 0 : i32
    return %c0_i32, %c0_i32_0 : i32, i32
  }
  func.func @transform_4(%arg0: i32) -> (i32, i32) {
    %c0_i32 = arith.constant 0 : i32
    %c0_i32_0 = arith.constant 0 : i32
    %c0_i32_1 = arith.constant 0 : i32
    return %c0_i32, %c0_i32_0 : i32, i32
  }
  func.func @transform_5(%arg0: i32) -> (i32, i32) {
    %c0_i32 = arith.constant 0 : i32
    %c0_i32_0 = arith.constant 0 : i32
    return %arg0, %c0_i32 : i32, i32
  }
}

</mosaic_0001>

<bundles_post_ra>
// kernel: tpu_custom_call.1
= control target key start
LH: loop header
LB: loop body
LE: loop exit
PB: predicated region body
PF: predicated region fallthrough
CT: control target
= control target key end

     0   :  { %s1411_s0 = inlined_call_operand.vmem [shape: f32[16,128], index: 0, kind: input, shape index: {}]   ;;  %s1412_s1 = inlined_call_operand.vmem [shape: f32[128,128], index: 1, kind: input, shape index: {}]   ;;  %s1413_s2 = inlined_call_operand.vmem [shape: f32[1,128], index: 2, kind: input, shape index: {}]   ;;  %s1414_s3 = inlined_call_operand.vmem [shape: f32[128,784], index: 3, kind: input, shape index: {}]   ;;  %s1415_s4 = inlined_call_operand.vmem [shape: f32[1,784], index: 4, kind: input, shape index: {}]   ;;  %s1416_s5 = inlined_call_operand.hbm [shape: f32[16,784], index: 5, kind: output, shape index: {}]  }
   0x1   :  { %v23_v0 = vld [vmem:[%s1412_s1] sm:$0xff]  ;;  %v24_v1 = vld [vmem:[%s1412_s1 + $0x8] sm:$0xff]  ;;  %v25_v2 = vld [vmem:[%s1412_s1 + $0x10] sm:$0xff] }
   0x2   :  { %v734_v3 = vpack.c.bf16 %v24_v1, %v23_v0  ;;  %v26_v4 = vld [vmem:[%s1412_s1 + $0x18] sm:$0xff]  ;;  %v27_v6 = vld [vmem:[%s1412_s1 + $0x20] sm:$0xff]  ;;  %v28_v7 = vld [vmem:[%s1412_s1 + $0x28] sm:$0xff] }
   0x3   :  { %v738_v5 = vpack.c.bf16 %v26_v4, %v25_v2  ;;  %v742_v8 = vpack.c.bf16 %v28_v7, %v27_v6  ;;  %v29_v9 = vld [vmem:[%s1412_s1 + $0x30] sm:$0xff]  ;;  %v21_v10 = vld [vmem:[%s1411_s0] sm:$0xff]  ;;  %v30_v11 = vld [vmem:[%s1412_s1 + $0x38] sm:$0xff] }
   0x4   :  { %735 = vmatprep.subr.bf16.mxu0 %v734_v3  ;;  %696 = vmatprep.mubr.f32.mxu0 %v21_v10  ;;  %v128_v12 = vld [vmem:[%s1414_s3 + $0x8] sm:$0xff]  ;;  %v135_v13 = vld [vmem:[%s1414_s3 + $0x40] sm:$0xff]  ;;  %v134_v16 = vld [vmem:[%s1414_s3 + $0x38] sm:$0xff]  ;;  %v746_v19 = vpack.c.bf16 %v30_v11, %v29_v9 }
   0x5   :  { %737 = vmatpush3.bf16.msra.mxu0 %v734_v3  ;;  %v766_v14 = vpack.c.bf16 %v135_v13, %v128_v12  ;;  %v127_v15 = vld [vmem:[%s1414_s3] sm:$0xff]  ;;  %v142_v18 = vld [vmem:[%s1414_s3 + $0x78] sm:$0xff]  ;;  %v149_v21 = vld [vmem:[%s1414_s3 + $0xb0] sm:$0xff] }
   0x6   :  { %739 = vmatprep.subr.bf16.mxu0 %v738_v5  ;;  %v768_v17 = vpack.c.bf16 %v134_v16, %v127_v15  ;;  %v31_v20 = vld [vmem:[%s1412_s1 + $0x40] sm:$0xff]  ;;  %v32_v22 = vld [vmem:[%s1412_s1 + $0x48] sm:$0xff]  ;;  %v770_v23 = vpack.c.bf16 %v149_v21, %v142_v18  ;;  %v141_v24 = vld [vmem:[%s1414_s3 + $0x70] sm:$0xff] }
   0x7   :  { %767 = vmatprep.subr.bf16.mxu1 %v766_v14  ;;  %v148_v25 = vld [vmem:[%s1414_s3 + $0xa8] sm:$0xff]  ;;  %v163_v28 = vld [vmem:[%s1414_s3 + $0x120] sm:$0xff]  ;;  %v750_v31 = vpack.c.bf16 %v32_v22, %v31_v20  ;;  %v33_v32 = vld [vmem:[%s1412_s1 + $0x50] sm:$0xff] }
   0x8   :  { %769 = vmatpush1.bf16.msra.mxu1 %v768_v17  ;;  %v772_v26 = vpack.c.bf16 %v148_v25, %v141_v24  ;;  %v156_v27 = vld [vmem:[%s1414_s3 + $0xe8] sm:$0xff]  ;;  %v155_v30 = vld [vmem:[%s1414_s3 + $0xe0] sm:$0xff]  ;;  %v162_v33 = vld [vmem:[%s1414_s3 + $0x118] sm:$0xff] }
   0x9   :  { %741 = vmatpush3.bf16.msra.mxu0 %v738_v5  ;;  %771 = vmatprep.subr.bf16.mxu1 %v770_v23  ;;  %v774_v29 = vpack.c.bf16 %v163_v28, %v156_v27  ;;  %v34_v34 = vld [vmem:[%s1412_s1 + $0x58] sm:$0xff]  ;;  %v776_v35 = vpack.c.bf16 %v162_v33, %v155_v30  ;;  %v177_v37 = vld [vmem:[%s1414_s3 + $0x190] sm:$0xff]  ;;  %v176_v40 = vld [vmem:[%s1414_s3 + $0x188] sm:$0xff] }
   0xa   :  { %743 = vmatprep.subr.bf16.mxu0 %v742_v8  ;;  %v170_v36 = vld [vmem:[%s1414_s3 + $0x158] sm:$0xff]  ;;  %v169_v39 = vld [vmem:[%s1414_s3 + $0x150] sm:$0xff]  ;;  %v184_v41 = vld [vmem:[%s1414_s3 + $0x1c8] sm:$0xff]  ;;  %v754_v42 = vpack.c.bf16 %v34_v34, %v33_v32 }
   0xb   :  { %v778_v38 = vpack.c.bf16 %v177_v37, %v170_v36  ;;  %v191_v43 = vld [vmem:[%s1414_s3 + $0x200] sm:$0xff]  ;;  %v36_v45 = vld [vmem:[%s1412_s1 + $0x68] sm:$0xff]  ;;  %v780_v46 = vpack.c.bf16 %v176_v40, %v169_v39  ;;  %v190_v49 = vld [vmem:[%s1414_s3 + $0x1f8] sm:$0xff] }
   0xc   :  { %773 = vmatpush1.bf16.msra.mxu1 %v772_v26  ;;  %v35_v44 = vld [vmem:[%s1412_s1 + $0x60] sm:$0xff]  ;;  %v782_v47 = vpack.c.bf16 %v191_v43, %v184_v41  ;;  %v198_v50 = vld [vmem:[%s1414_s3 + $0x238] sm:$0xff]  ;;  %v205_v51 = vld [vmem:[%s1414_s3 + $0x270] sm:$0xff] }
   0xd   :  { %745 = vmatpush3.bf16.msra.mxu0 %v742_v8  ;;  %775 = vmatprep.subr.bf16.mxu1 %v774_v29  ;;  %v183_v48 = vld [vmem:[%s1414_s3 + $0x1c0] sm:$0xff]  ;;  %v758_v52 = vpack.c.bf16 %v36_v45, %v35_v44  ;;  %v37_v53 = vld [vmem:[%s1412_s1 + $0x70] sm:$0xff]  ;;  %v38_v54 = vld [vmem:[%s1412_s1 + $0x78] sm:$0xff]  ;;  %v786_v56 = vpack.c.bf16 %v205_v51, %v198_v50 }
   0xe   :  { %747 = vmatprep.subr.bf16.mxu0 %v746_v19  ;;  %v784_v55 = vpack.c.bf16 %v190_v49, %v183_v48  ;;  %v197_v57 = vld [vmem:[%s1414_s3 + $0x230] sm:$0xff]  ;;  %v204_v58 = vld [vmem:[%s1414_s3 + $0x268] sm:$0xff]  ;;  %v219_v60 = vld [vmem:[%s1414_s3 + $0x2e0] sm:$0xff] }
   0xf   :  { %v212_v59 = vld [vmem:[%s1414_s3 + $0x2a8] sm:$0xff] }
  0x10   :  { %777 = vmatpush1.bf16.msra.mxu1 %v776_v35 }
  0x11   :  { %749 = vmatpush3.bf16.msra.mxu0 %v746_v19  ;;  %779 = vmatprep.subr.bf16.mxu1 %v778_v38 }
  0x12   :  { %751 = vmatprep.subr.bf16.mxu0 %v750_v31 }
  0x14   :  { %781 = vmatpush1.bf16.msra.mxu1 %v780_v46 }
  0x15   :  { %753 = vmatpush3.bf16.msra.mxu0 %v750_v31  ;;  %783 = vmatprep.subr.bf16.mxu1 %v782_v47 }
  0x16   :  { %755 = vmatprep.subr.bf16.mxu0 %v754_v42 }
  0x19   :  { %757 = vmatpush3.bf16.msra.mxu0 %v754_v42 }
  0x1a   :  { %10 = vsyncpa [#allocation3], 0  ;;  %759 = vmatprep.subr.bf16.mxu0 %v758_v52  ;;  %v762_v61 = vpack.c.bf16 %v38_v54, %v37_v53  ;;  %v130_v62 = vld [vmem:[%s1414_s3 + $0x18] sm:$0xff]  ;;  %v137_v63 = vld [vmem:[%s1414_s3 + $0x50] sm:$0xff]  ;;  %785 = vmatpush1.bf16.msra.mxu1 %v784_v55  ;;  %v788_v0 = vpack.c.bf16 %v204_v58, %v197_v57  ;;  %v790_v1 = vpack.c.bf16 %v219_v60, %v212_v59  ;;  %vm602_vm2 = vcmask 130048  }
  0x1b   :  { %787 = vmatprep.subr.bf16.mxu1 %v786_v56  ;;  %v211_v2 = vld [vmem:[%s1414_s3 + $0x2a0] sm:$0xff]  ;;  %v218_v3 = vld [vmem:[%s1414_s3 + $0x2d8] sm:$0xff]  ;;  %v798_v4 = vpack.c.bf16 %v137_v63, %v130_v62  ;;  %v129_v5 = vld [vmem:[%s1414_s3 + $0x10] sm:$0xff]  ;;  %v950_v63 = vmov 0.0  }
  0x1c   :  { %v136_v6 = vld [vmem:[%s1414_s3 + $0x48] sm:$0xff]  ;;  %v151_v8 = vld [vmem:[%s1414_s3 + $0xc0] sm:$0xff]  ;;  %v792_v9 = vpack.c.bf16 %v218_v3, %v211_v2  ;;  %v150_v14 = vld [vmem:[%s1414_s3 + $0xb8] sm:$0xff]  ;;  %340 = vmatprep.mubr.f32.mxu1 %v950_v63 }
  0x1d   :  { %761 = vmatpush3.bf16.msra.mxu0 %v758_v52  ;;  %v144_v7 = vld [vmem:[%s1414_s3 + $0x88] sm:$0xff]  ;;  %v800_v11 = vpack.c.bf16 %v136_v6, %v129_v5  ;;  %v143_v13 = vld [vmem:[%s1414_s3 + $0x80] sm:$0xff]  ;;  %v158_v15 = vld [vmem:[%s1414_s3 + $0xf8] sm:$0xff] }
  0x1e   :  { %763 = vmatprep.subr.bf16.mxu0 %v762_v61  ;;  %789 = vmatpush1.bf16.msra.mxu1 %v788_v0  ;;  %v22_v10 = vld [vmem:[%s1411_s0 + $0x8] sm:$0xff]  ;;  %v802_v12 = vpack.c.bf16 %v151_v8, %v144_v7  ;;  %v165_v16 = vld [vmem:[%s1414_s3 + $0x130] sm:$0xff]  ;;  %v804_v17 = vpack.c.bf16 %v150_v14, %v143_v13  ;;  %v179_v22 = vld [vmem:[%s1414_s3 + $0x1a0] sm:$0xff] }
  0x1f   :  { %791 = vmatprep.subr.bf16.mxu1 %v790_v1  ;;  %v806_v18 = vpack.c.bf16 %v165_v16, %v158_v15  ;;  %v157_v19 = vld [vmem:[%s1414_s3 + $0xf0] sm:$0xff]  ;;  %v164_v20 = vld [vmem:[%s1414_s3 + $0x128] sm:$0xff]  ;;  %v171_v25 = vld [vmem:[%s1414_s3 + $0x160] sm:$0xff] }
  0x20   :  { %v172_v21 = vld [vmem:[%s1414_s3 + $0x168] sm:$0xff]  ;;  %v808_v23 = vpack.c.bf16 %v164_v20, %v157_v19  ;;  %v178_v26 = vld [vmem:[%s1414_s3 + $0x198] sm:$0xff]  ;;  %v193_v28 = vld [vmem:[%s1414_s3 + $0x210] sm:$0xff] }
  0x21   :  { %765 = vmatpush3.bf16.msra.mxu0 %v762_v61  ;;  %v810_v24 = vpack.c.bf16 %v179_v22, %v172_v21  ;;  %v186_v27 = vld [vmem:[%s1414_s3 + $0x1d8] sm:$0xff]  ;;  %v812_v29 = vpack.c.bf16 %v178_v26, %v171_v25  ;;  %v185_v31 = vld [vmem:[%s1414_s3 + $0x1d0] sm:$0xff]  ;;  %v192_v32 = vld [vmem:[%s1414_s3 + $0x208] sm:$0xff] }
  0x22   :  { %799 = vmatprep.subr.bf16.mxu0 %v798_v4  ;;  %793 = vmatpush1.bf16.msra.mxu1 %v792_v9  ;;  %v814_v30 = vpack.c.bf16 %v193_v28, %v186_v27  ;;  %v200_v33 = vld [vmem:[%s1414_s3 + $0x248] sm:$0xff]  ;;  %v207_v34 = vld [vmem:[%s1414_s3 + $0x280] sm:$0xff]  ;;  %v816_v35 = vpack.c.bf16 %v192_v32, %v185_v31  ;;  %v206_v38 = vld [vmem:[%s1414_s3 + $0x278] sm:$0xff] }
  0x23   :  { %v818_v36 = vpack.c.bf16 %v207_v34, %v200_v33  ;;  %v199_v37 = vld [vmem:[%s1414_s3 + $0x240] sm:$0xff]  ;;  %v214_v39 = vld [vmem:[%s1414_s3 + $0x2b8] sm:$0xff]  ;;  %v221_v40 = vld [vmem:[%s1414_s3 + $0x2f0] sm:$0xff] }
  0x24   :  { %697 = vmatmul.mubr.f32.vlgmr.msra.gmra.mrb[0].mxu0 %v22_v10  ;;  %v820_v41 = vpack.c.bf16 %v206_v38, %v199_v37  ;;  %v822_v42 = vpack.c.bf16 %v221_v40, %v214_v39  ;;  %v213_v43 = vld [vmem:[%s1414_s3 + $0x2b0] sm:$0xff]  ;;  %v220_v44 = vld [vmem:[%s1414_s3 + $0x2e8] sm:$0xff]  ;;  %v226_v46 = vld [vmem:[%s1414_s3 + $0x318] sm:$0xff] }
  0x25   :  { %801 = vmatpush1.bf16.msra.mxu0 %v800_v11  ;;  %v824_v45 = vpack.c.bf16 %v220_v44, %v213_v43  ;;  %v233_v47 = vld [vmem:[%s1414_s3 + $0x350] sm:$0xff]  ;;  %v228_v48 = vld [vmem:[%s1414_s3 + $0x328] sm:$0xff]  ;;  %v235_v50 = vld [vmem:[%s1414_s3 + $0x360] sm:$0xff]  ;;  %417 = vmatprep.mubr.f32.mxu0 %v950_v63 }
  0x26   :  { %803 = vmatprep.subr.bf16.mxu0 %v802_v12  ;;  %v794_v49 = vpack.c.bf16 %v233_v47, %v226_v46  ;;  %v225_v51 = vld [vmem:[%s1414_s3 + $0x310] sm:$0xff]  ;;  %v826_v52 = vpack.c.bf16 %v235_v50, %v228_v48  ;;  %v232_v53 = vld [vmem:[%s1414_s3 + $0x348] sm:$0xff]  ;;  %v227_v54 = vld [vmem:[%s1414_s3 + $0x320] sm:$0xff] }
  0x27   :  { %v234_v55 = vld [vmem:[%s1414_s3 + $0x358] sm:$0xff]  ;;  %v796_v56 = vpack.c.bf16 %v232_v53, %v225_v51  ;;  %v132_v58 = vld [vmem:[%s1414_s3 + $0x28] sm:$0xff]  ;;  %v139_v59 = vld [vmem:[%s1414_s3 + $0x60] sm:$0xff] }
  0x28   :  { %795 = vmatprep.subr.bf16.mxu1 %v794_v49  ;;  %v828_v57 = vpack.c.bf16 %v234_v55, %v227_v54  ;;  %v133_v60 = vld [vmem:[%s1414_s3 + $0x30] sm:$0xff]  ;;  %v830_v61 = vpack.c.bf16 %v139_v59, %v132_v58  ;;  %v140_v62 = vld [vmem:[%s1414_s3 + $0x68] sm:$0xff]  ;;  %v627_v1 = vld [vmem:[%s1413_s2] ss:$0 sm:$0xff] }
  0x29   :  { %805 = vmatpush1.bf16.msra.mxu0 %v804_v17  ;;  %797 = vmatpush1.bf16.msra.mxu1 %v796_v56  ;;  %v862_v0 = vpack.c.bf16 %v140_v62, %v133_v60  ;;  %v131_v4 = vld [vmem:[%s1414_s3 + $0x20] sm:$0xff]  ;;  %v138_v5 = vld [vmem:[%s1414_s3 + $0x58] sm:$0xff]  ;;  %v153_v9 = vld [vmem:[%s1414_s3 + $0xd0] sm:$0xff] }
  0x2a   :  { %807 = vmatprep.subr.bf16.mxu0 %v806_v18  ;;  %831 = vmatprep.subr.bf16.mxu1 %v830_v61  ;;  %v146_v8 = vld [vmem:[%s1414_s3 + $0x98] sm:$0xff]  ;;  %v147_v10 = vld [vmem:[%s1414_s3 + $0xa0] sm:$0xff]  ;;  %v832_v13 = vpack.c.bf16 %v138_v5, %v131_v4  ;;  %v145_v14 = vld [vmem:[%s1414_s3 + $0x90] sm:$0xff] }
  0x2b   :  { %v154_v11 = vld [vmem:[%s1414_s3 + $0xd8] sm:$0xff]  ;;  %v152_v15 = vld [vmem:[%s1414_s3 + $0xc8] sm:$0xff]  ;;  %v834_v18 = vpack.c.bf16 %v153_v9, %v146_v8  ;;  %v167_v21 = vld [vmem:[%s1414_s3 + $0x140] sm:$0xff] }
  0x2c   :  { %v866_v19 = vpack.c.bf16 %v154_v11, %v147_v10  ;;  %v160_v20 = vld [vmem:[%s1414_s3 + $0x108] sm:$0xff]  ;;  %v161_v22 = vld [vmem:[%s1414_s3 + $0x110] sm:$0xff]  ;;  %v159_v26 = vld [vmem:[%s1414_s3 + $0x100] sm:$0xff] }
  0x2d   :  { %809 = vmatpush1.bf16.msra.mxu0 %v808_v23  ;;  %v168_v23 = vld [vmem:[%s1414_s3 + $0x148] sm:$0xff]  ;;  %v838_v25 = vpack.c.bf16 %v167_v21, %v160_v20  ;;  %v166_v27 = vld [vmem:[%s1414_s3 + $0x138] sm:$0xff]  ;;  %v181_v31 = vld [vmem:[%s1414_s3 + $0x1b0] sm:$0xff] }
  0x2e   :  { %811 = vmatprep.subr.bf16.mxu0 %v810_v24  ;;  %v836_v24 = vpack.c.bf16 %v152_v15, %v145_v14  ;;  %v174_v28 = vld [vmem:[%s1414_s3 + $0x178] sm:$0xff]  ;;  %v175_v32 = vld [vmem:[%s1414_s3 + $0x180] sm:$0xff]  ;;  %v840_v34 = vpack.c.bf16 %v166_v27, %v159_v26  ;;  %v173_v37 = vld [vmem:[%s1414_s3 + $0x170] sm:$0xff] }
  0x2f   :  { %v182_v33 = vld [vmem:[%s1414_s3 + $0x1b8] sm:$0xff]  ;;  %v180_v38 = vld [vmem:[%s1414_s3 + $0x1a8] sm:$0xff]  ;;  %v195_v40 = vld [vmem:[%s1414_s3 + $0x220] sm:$0xff] }
  0x30   :  { %v188_v39 = vld [vmem:[%s1414_s3 + $0x1e8] sm:$0xff]  ;;  %v844_v43 = vpack.c.bf16 %v180_v38, %v173_v37  ;;  %v187_v46 = vld [vmem:[%s1414_s3 + $0x1e0] sm:$0xff]  ;;  %v194_v47 = vld [vmem:[%s1414_s3 + $0x218] sm:$0xff] }
  0x31   :  { %813 = vmatpush1.bf16.msra.mxu0 %v812_v29  ;;  %v846_v44 = vpack.c.bf16 %v195_v40, %v188_v39  ;;  %v202_v48 = vld [vmem:[%s1414_s3 + $0x258] sm:$0xff]  ;;  %v209_v49 = vld [vmem:[%s1414_s3 + $0x290] sm:$0xff]  ;;  %v203_v50 = vld [vmem:[%s1414_s3 + $0x260] sm:$0xff] }
  0x32   :  { %815 = vmatprep.subr.bf16.mxu0 %v814_v30  ;;  %v870_v30 = vpack.c.bf16 %v168_v23, %v161_v22  ;;  %v210_v51 = vld [vmem:[%s1414_s3 + $0x298] sm:$0xff]  ;;  %v850_v53 = vpack.c.bf16 %v209_v49, %v202_v48  ;;  %v201_v55 = vld [vmem:[%s1414_s3 + $0x250] sm:$0xff]  ;;  %v208_v56 = vld [vmem:[%s1414_s3 + $0x288] sm:$0xff] }
  0x33   :  { %v882_v54 = vpack.c.bf16 %v210_v51, %v203_v50  ;;  %v223_v58 = vld [vmem:[%s1414_s3 + $0x300] sm:$0xff]  ;;  %v217_v59 = vld [vmem:[%s1414_s3 + $0x2d0] sm:$0xff]  ;;  %v224_v60 = vld [vmem:[%s1414_s3 + $0x308] sm:$0xff]  ;;  %v852_v61 = vpack.c.bf16 %v208_v56, %v201_v55 }
  0x34   :  { %v237_v4 = vld [vmem:[%s1414_s3 + $0x370] sm:$0xff]  ;;  %v231_v5 = vld [vmem:[%s1414_s3 + $0x340] sm:$0xff]  ;;  %v236_v11 = vld [vmem:[%s1414_s3 + $0x368] sm:$0xff] }
  0x35   :  { %817 = vmatpush1.bf16.msra.mxu0 %v816_v35  ;;  %v842_v35 = vpack.c.bf16 %v181_v31, %v174_v28  ;;  %v229_v10 = vld [vmem:[%s1414_s3 + $0x330] sm:$0xff] }
  0x36   :  { %819 = vmatprep.subr.bf16.mxu0 %v818_v36  ;;  %v874_v36 = vpack.c.bf16 %v182_v33, %v175_v32 }
  0x39   :  { %821 = vmatpush1.bf16.msra.mxu0 %v820_v41  ;;  %v189_v41 = vld [vmem:[%s1414_s3 + $0x1f0] sm:$0xff] }
  0x3a   :  { %823 = vmatprep.subr.bf16.mxu0 %v822_v42  ;;  %v196_v42 = vld [vmem:[%s1414_s3 + $0x228] sm:$0xff] }
  0x3d   :  { %825 = vmatpush1.bf16.msra.mxu0 %v824_v45  ;;  %v878_v45 = vpack.c.bf16 %v196_v42, %v189_v41 }
  0x3e   :  { %827 = vmatprep.subr.bf16.mxu0 %v826_v52  ;;  %v848_v52 = vpack.c.bf16 %v194_v47, %v187_v46 }
  0x41   :  { %829 = vmatpush1.bf16.msra.mxu0 %v828_v57  ;;  %v216_v57 = vld [vmem:[%s1414_s3 + $0x2c8] sm:$0xff] }
  0x42   :  { %863 = vmatprep.subr.bf16.mxu0 %v862_v0  ;;  %v854_v62 = vpack.c.bf16 %v223_v58, %v216_v57 }
  0xf7   :  { %v698_v2 = vpop.f32.mrb[0].mxu0 }
  0xf8   :  { %v112_v3 = vpop.f32.mrb[1].mxu0  ;;  %v118_v6 = vadd.f32 %v698_v2, %v627_v1  ;;  %v222_v2 = vld [vmem:[%s1414_s3 + $0x2f8] sm:$0xff] }
  0xf9   :  { %v113_v7 = vadd.f32 %v627_v1, %v112_v3  ;;  %v215_v1 = vld [vmem:[%s1414_s3 + $0x2c0] sm:$0xff]  ;;  %v230_v3 = vld [vmem:[%s1414_s3 + $0x338] sm:$0xff] }
  0xfa   :  { %v124_v16 = vmul.f32 0.2, %v118_v6  ;;  %vm122_vm1 = vcmp.gt.f32.partialorder %v118_v6, 0.0  ;;  %v858_v8 = vpack.c.bf16 %v237_v4, %v230_v3 }
  0xfb   :  { %vm121_vm0 = vcmp.gt.f32.partialorder %v113_v7, 0.0  ;;  %v123_v12 = vmul.f32 0.2, %v113_v7 }
  0xfc   :  { %v1299_v29 = vsel %vm122_vm1, %v118_v6, %v124_v16  ;;  %v238_v6 = vld [vmem:[%s1414_s3 + $0x378] sm:$0xff] }
  0xfd   :  { %v1271_v17 = vsel %vm121_vm0, %v113_v7, %v123_v12  ;;  %v856_v7 = vpack.c.bf16 %v222_v2, %v215_v1  ;;  %v890_v9 = vpack.c.bf16 %v238_v6, %v231_v5  ;;  %v860_v12 = vpack.c.bf16 %v236_v11, %v229_v10 }
  0xfe   :  { %341 = vmatmul.mubr.f32.vlgmr.msra.gmra.mrb[0].mxu1 %v1271_v17  ;;  %418 = vmatmul.mubr.f32.vlgmr.msra.gmra.mrb[2].mxu0 %v1271_v17 }
  0xff   :  { %833 = vmatpush1.bf16.msra.mxu1 %v832_v13  ;;  %865 = vmatpush3.bf16.msra.mxu0 %v862_v0  ;;  %v886_v0 = vpack.c.bf16 %v224_v60, %v217_v59  ;;  %v241_v13 = vlaneseq }
 0x100   :  { %346 = vmatprep.mubr.f32.mxu1 %v950_v63  ;;  %423 = vmatprep.mubr.f32.mxu0 %v950_v63 }
 0x101   :  { %835 = vmatprep.subr.bf16.mxu1 %v834_v18  ;;  %867 = vmatprep.subr.bf16.mxu0 %v866_v19  ;;  %v242_v14 = vshrl.u32 %v241_v13, 7  ;;  %v239_v18 = vld [vmem:[%s1415_s4] sm:$0x7f]  ;;  %s951_s4 = smov [#allocation2]  }
 0x102   :  { %347 = vmatmul.mubr.f32.gmra.mrb[2].mxu1 %v1299_v29  ;;  %424 = vmatmul.mubr.f32.gmra.mrb[4].mxu0 %v1299_v29  ;;  %s616_s15 = sshll.u32 %s951_s4, 4  ;;  %s617_s15 = int_to_ptr.vmem [resolvable:$true] %s616_s15 }
 0x103   :  { %837 = vmatpush1.bf16.msra.mxu1 %v836_v24  ;;  %869 = vmatpush3.bf16.msra.mxu0 %v866_v19  ;;  %v243_v15 = vsub.s32 0, %v242_v14  ;;  %v251_v16 = vsub.s32 2, %v242_v14  ;;  %v247_v19 = vsub.s32 1, %v242_v14  ;;  %v255_v20 = vsub.s32 3, %v242_v14  ;;  %s926_s16 = scalar_lea.vmem %s617_s15, 1792  ;;  %p931_p1 = scmp.lt.s32.totalorder %s617_s15, %s617_s15 }
 0x104   :  { %731 = vmatprep.mubr.f32.mxu0 %v1271_v17  ;;  %839 = vmatprep.subr.bf16.mxu1 %v838_v25  ;;  %v259_v47 = vsub.s32 4, %v242_v14  ;;  %v267_v48 = vsub.s32 6, %v242_v14  ;;  %v263_v49 = vsub.s32 5, %v242_v14  ;;  %p927_p0 = scmp.ne.s32.totalorder %s617_s15, %s926_s16  ;;  %p932_p2 = scmp.lt.s32.totalorder %s926_s16, %s926_s16 }
 0x105   :  { %871 = vmatprep.subr.bf16.mxu0 %v870_v30  ;;  %494 = vmatprep.mubr.f32.mxu1 %v950_v63  ;;  %v244_v21 = vrot.slane %v239_v18, %v243_v15  ;;  %v252_v22 = vrot.slane %v239_v18, %v251_v16  ;;  %v248_v23 = vrot.slane %v239_v18, %v247_v19 }
 0x106   :  { %v260_v50 = vrot.slane %v239_v18, %v259_v47  ;;  %v268_v51 = vrot.slane %v239_v18, %v267_v48  ;;  %p933_p3 = por %p932_p2, %p931_p1 }
 0x107   :  { %841 = vmatpush1.bf16.msra.mxu1 %v840_v34  ;;  %873 = vmatpush3.bf16.msra.mxu0 %v870_v30 }
 0x108   :  { %843 = vmatprep.subr.bf16.mxu1 %v842_v35  ;;  %875 = vmatprep.subr.bf16.mxu0 %v874_v36  ;;  %p934_p4 = pnand %p933_p3, %p927_p0 }
 0x10b   :  { %845 = vmatpush1.bf16.msra.mxu1 %v844_v43  ;;  %877 = vmatpush3.bf16.msra.mxu0 %v874_v36 }
 0x10c   :  { %847 = vmatprep.subr.bf16.mxu1 %v846_v44  ;;  %879 = vmatprep.subr.bf16.mxu0 %v878_v45 }
 0x10f   :  { %849 = vmatpush1.bf16.msra.mxu1 %v848_v52  ;;  %881 = vmatpush3.bf16.msra.mxu0 %v878_v45  ;;  %v264_v52 = vrot.slane %v239_v18, %v263_v49 }
 0x110   :  { %851 = vmatprep.subr.bf16.mxu1 %v850_v53  ;;  %883 = vmatprep.subr.bf16.mxu0 %v882_v54 }
 0x113   :  { %853 = vmatpush1.bf16.msra.mxu1 %v852_v61  ;;  %885 = vmatpush3.bf16.msra.mxu0 %v882_v54 }
 0x114   :  { %855 = vmatprep.subr.bf16.mxu1 %v854_v62  ;;  %887 = vmatprep.subr.bf16.mxu0 %v886_v0 }
 0x117   :  { %857 = vmatpush1.bf16.msra.mxu1 %v856_v7  ;;  %889 = vmatpush3.bf16.msra.mxu0 %v886_v0 }
 0x118   :  { %859 = vmatprep.subr.bf16.mxu1 %v858_v8  ;;  %891 = vmatprep.subr.bf16.mxu0 %v890_v9 }
 0x11b   :  { %861 = vmatpush1.bf16.msra.mxu1 %v860_v12  ;;  %893 = vmatpush3.bf16.msra.mxu0 %v890_v9 }
 0x11e   :  { %495 = vmatmul.mubr.f32.vlgmr.msra.gmra.mrb[4].mxu1 %v1271_v17  ;;  %732 = vmatmul.mubr.f32.vlgmr.msra.gmra.mrb[6].mxu0 %v1299_v29  ;;  %v256_v17 = vrot.slane %v239_v18, %v255_v20 }
 0x11f   :  { %500 = vmatprep.mubr.f32.mxu1 %v950_v63 }
 0x122   :  { %501 = vmatmul.mubr.f32.gmra.mrb[6].mxu1 %v1299_v29 }
 0x1d1   :  { %v342_v24 = vpop.f32.mrb[0].mxu1  ;;  %v419_v25 = vpop.f32.mrb[2].mxu0 }
 0x1d2   :  { %v343_v26 = vadd.f32 %v342_v24, %v244_v21  ;;  %v420_v63 = vadd.f32 %v419_v25, %v252_v22  ;;  %v344_v27 = vpop.f32.mrb[1].mxu1  ;;  %v421_v28 = vpop.f32.mrb[3].mxu0 }
 0x1d3   :  { %v345_v29 = vadd.f32 %v344_v27, %v248_v23  ;;  %v422_v30 = vadd.f32 %v421_v28, %v256_v17 }
 0x1d4   :  { %898 = vtanh.f32 %v343_v26 }
 0x1d5   :  { %900 = vtanh.f32 %v420_v63  ;;  %v348_v31 = vpop.f32.mrb[2].mxu1  ;;  %v425_v32 = vpop.f32.mrb[4].mxu0 }
 0x1d6   :  { %902 = vtanh.f32 %v345_v29  ;;  %v349_v33 = vadd.f32 %v348_v31, %v244_v21  ;;  %v426_v34 = vadd.f32 %v425_v32, %v252_v22  ;;  %v350_v35 = vpop.f32.mrb[3].mxu1  ;;  %v427_v36 = vpop.f32.mrb[5].mxu0 }
 0x1d7   :  { %904 = vtanh.f32 %v422_v30  ;;  %v351_v37 = vadd.f32 %v350_v35, %v248_v23  ;;  %v428_v38 = vadd.f32 %v427_v36, %v256_v17 }
 0x1d8   :  { %906 = vtanh.f32 %v349_v33 }
 0x1d9   :  { %908 = vtanh.f32 %v426_v34 }
 0x1da   :  { %910 = vtanh.f32 %v351_v37 }
 0x1db   :  { %912 = vtanh.f32 %v428_v38 }
 0x1de   :  { %v899_v39 = vpop.eup %898 }
 0x1df   :  { %v901_v40 = vpop.eup %900  ;;  %596 = vst [vmem:[#allocation2] sm:$0xff] %v899_v39 }
 0x1e0   :  { %v903_v41 = vpop.eup %902  ;;  %598 = vst [vmem:[#allocation2 + $0x10] sm:$0xff] %v901_v40 }
 0x1e1   :  { %v905_v42 = vpop.eup %904  ;;  %597 = vst [vmem:[#allocation2 + $0x8] sm:$0xff] %v903_v41 }
 0x1e2   :  { %v907_v43 = vpop.eup %906  ;;  %599 = vst [vmem:[#allocation2 + $0x18] sm:$0xff] %v905_v42 }
 0x1e3   :  { %v909_v44 = vpop.eup %908  ;;  %604 = vst [vmem:[#allocation2 + $0x38] sm:$0xff] %v907_v43 }
 0x1e4   :  { %v911_v45 = vpop.eup %910  ;;  %606 = vst [vmem:[#allocation2 + $0x48] sm:$0xff] %v909_v44 }
 0x1e5   :  { %v913_v46 = vpop.eup %912  ;;  %605 = vst [vmem:[#allocation2 + $0x40] sm:$0xff] %v911_v45 }
 0x1e6   :  { %607 = vst [vmem:[#allocation2 + $0x50] sm:$0xff] %v913_v46 }
 0x1f1   :  { %v496_v53 = vpop.f32.mrb[4].mxu1  ;;  %v733_v54 = vpop.f32.mrb[6].mxu0 }
 0x1f2   :  { %v497_v55 = vadd.f32 %v496_v53, %v260_v50  ;;  %v579_v56 = vadd.f32 %v733_v54, %v268_v51  ;;  %v498_v57 = vpop.f32.mrb[5].mxu1  ;;  %v573_v58 = vpop.f32.mrb[7].mxu0 }
 0x1f3   :  { %v499_v59 = vadd.f32 %v498_v57, %v264_v52  ;;  %v574_v60 = vadd.f32 %v573_v58, %v268_v51 }
 0x1f4   :  { %914 = vtanh.f32 %v497_v55 }
 0x1f5   :  { %916 = vtanh.f32 %v579_v56  ;;  %v502_v61 = vpop.f32.mrb[6].mxu1 }
 0x1f6   :  { %918 = vtanh.f32 %v499_v59  ;;  %v503_v62 = vadd.f32 %v502_v61, %v260_v50  ;;  %v504_v0 = vpop.f32.mrb[7].mxu1 }
 0x1f7   :  { %920 = vtanh.f32 %v574_v60  ;;  %v505_v1 = vadd.f32 %v504_v0, %v264_v52 }
 0x1f8   :  { %922 = vtanh.f32 %v503_v62 }
 0x1f9   :  { %924 = vtanh.f32 %v505_v1 }
 0x1fe   :  { %v915_v2 = vpop.eup %914 }
 0x1ff   :  { %v917_v3 = vpop.eup %916  ;;  %600 = vst [vmem:[#allocation2 + $0x20] sm:$0xff] %v915_v2 }
 0x200   :  { %v919_v4 = vpop.eup %918  ;;  %610 = vst.msk [vmem:[#allocation2 + $0x68] sm:$0xff] %vm602_vm2, %v917_v3 }
 0x201   :  { %v921_v5 = vpop.eup %920  ;;  %601 = vst [vmem:[#allocation2 + $0x28] sm:$0xff] %v919_v4 }
 0x202   :  { %v923_v6 = vpop.eup %922  ;;  %603 = vst.msk [vmem:[#allocation2 + $0x30] sm:$0xff] %vm602_vm2, %v921_v5 }
 0x203   :  { %v925_v7 = vpop.eup %924  ;;  %608 = vst [vmem:[#allocation2 + $0x58] sm:$0xff] %v923_v6 }
 0x204   :  { %609 = vst [vmem:[#allocation2 + $0x60] sm:$0xff] %v925_v7 }
 0x205   :  { %937 = shalt.err (!%p934_p4)
}
 0x206   :  { %s938_s18 = scalar_lea.hbm %s1416_s5, 1792 }
 0x207   :  { %p939_p5 = scmp.ne.s32.totalorder %s1416_s5, %s938_s18  ;;  %p942_p6 = scmp.lt.u32.totalorder %s938_s18, %s1416_s5 }
 0x209   :  { %p944_p7 = pnand %p942_p6, %p939_p5 }
 0x20b   :  { %947 = shalt.err (!%p944_p7)
}
 0x20c   :  { %s952_s23 = smov 896   ;;  %s953_s24 = smov 56  }
 0x20d   :  { %622 = dma.vmem_to_hbm [thread:$0]  %s617_s15, 1792, %s1416_s5, [#allocation3], %s952_s23, %s952_s23, %s953_s24  }
 0x20e   :  { %948 = dma.done.wait [#allocation3], 1792  }
 0x20f   :  { %949 = vsyncadd [#allocation3], 4294965504 }
 0x210   :  { %626 = vsyncpa [#allocation3], 1 }

</bundles_post_ra>
